<compile_context>
chip_gen: v5e
topology: v5e:2x2
jax: 0.10.0
libtpu: 0.0.40
codegen_flags: <defaults>
</compile_context>

<pallas_src>
import functools

import jax
import jax.numpy as jnp
from jax import lax
from jax.experimental import pallas as pl
from jax.experimental.pallas import tpu as pltpu

EPS = 1e-5


def dense_layer_kernel(x_ref, lmask_ref, rmask_ref,
                       g1_ref, b1_ref, w1_ref, c1b_ref,
                       g2_ref, b2_ref, w2s_ref, c2b_ref,
                       out_ref, *, g, count):
    """Single-invocation kernel.  Operands are channel-major with the batch packed
    on the lane axis: x is (Cin, N*L), output is (Cin+G, N*L)."""
    x = x_ref[...]                                            # (Cin, NL)
    inv_n = 1.0 / count
    nl = x.shape[1]
    cin = x.shape[0]

    # ---- BN1 (training-mode batch stats, two-pass centered variance) + ReLU ----
    mean1 = jnp.sum(x, axis=1, keepdims=True) * inv_n         # (Cin, 1)
    xc = x - mean1
    var1 = jnp.sum(xc * xc, axis=1, keepdims=True) * inv_n
    s1 = g1_ref[...] * lax.rsqrt(var1 + EPS)
    h1 = jnp.maximum(xc * s1 + b1_ref[...], 0.0)              # (Cin, NL)

    # ---- conv1: 1x1 conv == one MXU matmul over channels ----
    h2 = jnp.dot(w1_ref[...], h1,
                 preferred_element_type=jnp.float32) + c1b_ref[...]   # (4g, NL)

    # ---- BN2 + ReLU (same two-pass stats) ----
    mean2 = jnp.sum(h2, axis=1, keepdims=True) * inv_n
    h2c = h2 - mean2
    var2 = jnp.sum(h2c * h2c, axis=1, keepdims=True) * inv_n
    s2 = g2_ref[...] * lax.rsqrt(var2 + EPS)
    h3 = jnp.maximum(h2c * s2 + b2_ref[...], 0.0)             # (4g, NL)

    # ---- conv2 (k=3, pad=1): all three taps in one stacked matmul on the
    # UNSHIFTED activations; only the small (g, NL) tap results are shifted along
    # lanes via pltpu.roll (XLU), with boundary masks so nothing leaks across the
    # packed per-sequence boundaries. ----
    taps = jnp.dot(w2s_ref[...], h3,
                   preferred_element_type=jnp.float32)        # (3g, NL)
    t_km1 = taps[0 * g:1 * g, :]     # tap k=0 -> needs h3[:, l-1]
    t_k0 = taps[1 * g:2 * g, :]      # tap k=1 -> h3[:, l]
    t_kp1 = taps[2 * g:3 * g, :]     # tap k=2 -> needs h3[:, l+1]

    from_left = pltpu.roll(t_km1, shift=1, axis=1) * lmask_ref[...]
    from_right = pltpu.roll(t_kp1, shift=nl - 1, axis=1) * rmask_ref[...]
    y = t_k0 + from_left + from_right + c2b_ref[...]          # (g, NL)

    # ---- fused channel concat: out = [x ; conv2 output] ----
    # (Cin is not forced to a multiple of 8 here, so these are two sublane-partial
    #  stores; negligible at these channel counts.)
    out_ref[:cin, :] = x
    out_ref[cin:, :] = y


def dense_layer_forward(x_ncl, params):
    """x_ncl: (N, Cin, L) f32 -> (N, Cin + growth_rate, L) f32 (fused concat)."""
    N, Cin, L = x_ncl.shape
    C4 = params['w1'].shape[0]        # 4 * growth_rate
    G = params['c2b'].shape[0]        # growth_rate
    NL = N * L

    # Layout plumbing (wrapper side): channel-major, batch packed on the lane axis.
    x_cm = jnp.transpose(x_ncl.astype(jnp.float32), (1, 0, 2)).reshape(Cin, NL)

    # Per-sequence boundary masks for the +-1 conv2 taps.
    pos = jnp.arange(NL, dtype=jnp.int32) % L
    lmask = (pos != 0).astype(jnp.float32).reshape(1, NL)
    rmask = (pos != L - 1).astype(jnp.float32).reshape(1, NL)

    # Whole-problem VMEM residency: x, all intermediates and the concatenated
    # output live in VMEM for one kernel invocation (x read from HBM once).
    # Budget chosen to be safe on v7x (64 MiB physical) as well as v5e/v6e.
    est_bytes = 4 * (NL * (3 * Cin + 5 * C4 + 7 * G + 2)
                     + C4 * Cin + 3 * G * C4 + 4 * (Cin + C4 + G))
    vmem_budget = 32 * 1024 * 1024
    assert est_bytes < vmem_budget, (
        "DenseLayer block too large for single-shot VMEM residency")
    # TODO(synk): batch-tiled multi-phase fallback (and v7x dual-core batch split)
    # for shapes exceeding the VMEM budget.

    kernel = functools.partial(dense_layer_kernel, g=G, count=float(NL))
    vmem_spec = pl.BlockSpec(memory_space=pltpu.MemorySpace.VMEM)

    out_cm = pl.pallas_call(
        kernel,
        out_shape=jax.ShapeDtypeStruct((Cin + G, NL), jnp.float32),
        in_specs=[vmem_spec] * 11,
        out_specs=vmem_spec,
        compiler_params=pltpu.CompilerParams(vmem_limit_bytes=vmem_budget),
    )(x_cm, lmask, rmask,
      params['g1'], params['b1'], params['w1'], params['c1b'],
      params['g2'], params['b2'], params['w2s'], params['c2b'])

    return out_cm.reshape(Cin + G, N, L).transpose(1, 0, 2)


def make_params(key, in_channels, growth_rate):
    c4 = 4 * growth_rate
    k1, k2, k3, k4 = jax.random.split(key, 4)
    # PyTorch-layout conv weights (out, in, K)
    w1_pt = jax.random.normal(k1, (c4, in_channels, 1), jnp.float32) * 0.1
    c1b = jax.random.normal(k2, (c4,), jnp.float32) * 0.1
    w2_pt = jax.random.normal(k3, (growth_rate, c4, 3), jnp.float32) * 0.1
    c2b = jax.random.normal(k4, (growth_rate,), jnp.float32) * 0.1
    # BatchNorm defaults on a fresh module: gamma=1, beta=0
    g1 = jnp.ones((in_channels,), jnp.float32)
    b1 = jnp.zeros((in_channels,), jnp.float32)
    g2 = jnp.ones((c4,), jnp.float32)
    b2 = jnp.zeros((c4,), jnp.float32)

    kernel_params = dict(
        g1=g1.reshape(-1, 1), b1=b1.reshape(-1, 1),
        w1=w1_pt[:, :, 0],                                        # (4g, Cin)
        c1b=c1b.reshape(-1, 1),
        g2=g2.reshape(-1, 1), b2=b2.reshape(-1, 1),
        # taps stacked on rows: w2s[k*g + o, c] = w2_pt[o, c, k]
        w2s=jnp.transpose(w2_pt, (2, 0, 1)).reshape(3 * growth_rate, c4),
        c2b=c2b.reshape(-1, 1),
    )
    torch_params = dict(w1_pt=w1_pt, c1b=c1b, w2_pt=w2_pt, c2b=c2b,
                        g1=g1, b1=b1, g2=g2, b2=b2)
    return kernel_params, torch_params


def reference_forward(x, p):
    """Pure-JAX replica of the PyTorch forward (NCL layout, training-mode BN)."""
    def bn_relu(h, gamma, beta):
        m = h.mean(axis=(0, 2), keepdims=True)
        v = ((h - m) ** 2).mean(axis=(0, 2), keepdims=True)
        return jnp.maximum((h - m) / jnp.sqrt(v + EPS)
                           * gamma[None, :, None] + beta[None, :, None], 0.0)
    h = bn_relu(x, p['g1'], p['b1'])
    h = lax.conv_general_dilated(h, p['w1_pt'], (1,), [(0, 0)],
                                 dimension_numbers=('NCH', 'OIH', 'NCH'))
    h = h + p['c1b'][None, :, None]
    h = bn_relu(h, p['g2'], p['b2'])
    h = lax.conv_general_dilated(h, p['w2_pt'], (1,), [(1, 1)],
                                 dimension_numbers=('NCH', 'OIH', 'NCH'))
    h = h + p['c2b'][None, :, None]
    return jnp.concatenate([x, h], axis=1)


if __name__ == "__main__":
    # Small but lane-dense demo: N * L = 128 packs exactly one full lane extent.
    N, Cin, L = 8, 4, 16
    growth_rate = 8

    key = jax.random.PRNGKey(0)
    kx, kp = jax.random.split(key)
    x = jax.random.normal(kx, (N, Cin, L), jnp.float32)
    kernel_params, torch_params = make_params(kp, Cin, growth_rate)

    y = dense_layer_forward(x, kernel_params)
    y = jax.block_until_ready(y)

    y_ref = reference_forward(x, torch_params)
    assert y.shape == (N, Cin + growth_rate, L)
    assert jnp.allclose(y, y_ref, atol=1e-4, rtol=1e-4), "mismatch vs reference"

    print("KERNEL_OK")
</pallas_src>

<mosaic_0001>
module attributes {stable_mosaic.version = 11 : i64} {
  func.func @dense_layer_kernel(%arg0: memref<4x128xf32, #tpu.memory_space<vmem>>, %arg1: memref<1x128xf32, #tpu.memory_space<vmem>>, %arg2: memref<1x128xf32, #tpu.memory_space<vmem>>, %arg3: memref<4x1xf32, #tpu.memory_space<vmem>>, %arg4: memref<4x1xf32, #tpu.memory_space<vmem>>, %arg5: memref<32x4xf32, #tpu.memory_space<vmem>>, %arg6: memref<32x1xf32, #tpu.memory_space<vmem>>, %arg7: memref<32x1xf32, #tpu.memory_space<vmem>>, %arg8: memref<32x1xf32, #tpu.memory_space<vmem>>, %arg9: memref<24x32xf32, #tpu.memory_space<vmem>>, %arg10: memref<8x1xf32, #tpu.memory_space<vmem>>, %arg11: memref<12x128xf32, #tpu.memory_space<vmem>>) attributes {dimension_semantics = [], scalar_prefetch = 0 : i64, scratch_operands = 0 : i64, tpu.core_type = #tpu.core_type<tc>} {
    %c0 = arith.constant 0 : index
    %c0_0 = arith.constant 0 : index
    %0 = vector.load %arg0[%c0, %c0_0] : memref<4x128xf32, #tpu.memory_space<vmem>>, vector<4x128xf32>
    %cst = arith.constant dense<0.000000e+00> : vector<4xf32>
    %1 = vector.multi_reduction <add>, %0, %cst [1] : vector<4x128xf32> to vector<4xf32>
    %2 = vector.shape_cast %1 : vector<4xf32> to vector<4x1xf32>
    %cst_1 = arith.constant 7.812500e-03 : f32
    %3 = vector.broadcast %cst_1 : f32 to vector<4x1xf32>
    %4 = arith.mulf %2, %3 : vector<4x1xf32>
    %5 = vector.broadcast %4 : vector<4x1xf32> to vector<4x128xf32>
    %6 = arith.subf %0, %5 : vector<4x128xf32>
    %7 = arith.mulf %6, %6 : vector<4x128xf32>
    %cst_2 = arith.constant dense<0.000000e+00> : vector<4xf32>
    %8 = vector.multi_reduction <add>, %7, %cst_2 [1] : vector<4x128xf32> to vector<4xf32>
    %9 = vector.shape_cast %8 : vector<4xf32> to vector<4x1xf32>
    %cst_3 = arith.constant 7.812500e-03 : f32
    %10 = vector.broadcast %cst_3 : f32 to vector<4x1xf32>
    %11 = arith.mulf %9, %10 : vector<4x1xf32>
    %c0_4 = arith.constant 0 : index
    %c0_5 = arith.constant 0 : index
    %12 = vector.load %arg3[%c0_4, %c0_5] : memref<4x1xf32, #tpu.memory_space<vmem>>, vector<4x1xf32>
    %cst_6 = arith.constant 9.99999974E-6 : f32
    %13 = vector.broadcast %cst_6 : f32 to vector<4x1xf32>
    %14 = arith.addf %11, %13 : vector<4x1xf32>
    %15 = math.rsqrt %14 : vector<4x1xf32>
    %16 = arith.mulf %12, %15 : vector<4x1xf32>
    %17 = vector.broadcast %16 : vector<4x1xf32> to vector<4x128xf32>
    %18 = arith.mulf %6, %17 : vector<4x128xf32>
    %c0_7 = arith.constant 0 : index
    %c0_8 = arith.constant 0 : index
    %19 = vector.load %arg4[%c0_7, %c0_8] : memref<4x1xf32, #tpu.memory_space<vmem>>, vector<4x1xf32>
    %20 = vector.broadcast %19 : vector<4x1xf32> to vector<4x128xf32>
    %21 = arith.addf %18, %20 : vector<4x128xf32>
    %cst_9 = arith.constant 0.000000e+00 : f32
    %22 = vector.broadcast %cst_9 : f32 to vector<4x128xf32>
    %23 = arith.maximumf %21, %22 : vector<4x128xf32>
    %c0_10 = arith.constant 0 : index
    %c0_11 = arith.constant 0 : index
    %24 = vector.load %arg5[%c0_10, %c0_11] : memref<32x4xf32, #tpu.memory_space<vmem>>, vector<32x4xf32>
    %cst_12 = arith.constant dense<0.000000e+00> : vector<32x128xf32>
    %25 = tpu.matmul %24, %23, %cst_12 {dimension_numbers = #tpu.dot_dimension_numbers<[1], [0], [0], [1], [0, 0, 1, 1], [], []>} : vector<32x4xf32>, vector<4x128xf32>, vector<32x128xf32> -> vector<32x128xf32>
    %c0_13 = arith.constant 0 : index
    %c0_14 = arith.constant 0 : index
    %26 = vector.load %arg6[%c0_13, %c0_14] : memref<32x1xf32, #tpu.memory_space<vmem>>, vector<32x1xf32>
    %27 = vector.broadcast %26 : vector<32x1xf32> to vector<32x128xf32>
    %28 = arith.addf %25, %27 : vector<32x128xf32>
    %cst_15 = arith.constant dense<0.000000e+00> : vector<32xf32>
    %29 = vector.multi_reduction <add>, %28, %cst_15 [1] : vector<32x128xf32> to vector<32xf32>
    %30 = vector.shape_cast %29 : vector<32xf32> to vector<32x1xf32>
    %cst_16 = arith.constant 7.812500e-03 : f32
    %31 = vector.broadcast %cst_16 : f32 to vector<32x1xf32>
    %32 = arith.mulf %30, %31 : vector<32x1xf32>
    %33 = vector.broadcast %32 : vector<32x1xf32> to vector<32x128xf32>
    %34 = arith.subf %28, %33 : vector<32x128xf32>
    %35 = arith.mulf %34, %34 : vector<32x128xf32>
    %cst_17 = arith.constant dense<0.000000e+00> : vector<32xf32>
    %36 = vector.multi_reduction <add>, %35, %cst_17 [1] : vector<32x128xf32> to vector<32xf32>
    %37 = vector.shape_cast %36 : vector<32xf32> to vector<32x1xf32>
    %cst_18 = arith.constant 7.812500e-03 : f32
    %38 = vector.broadcast %cst_18 : f32 to vector<32x1xf32>
    %39 = arith.mulf %37, %38 : vector<32x1xf32>
    %c0_19 = arith.constant 0 : index
    %c0_20 = arith.constant 0 : index
    %40 = vector.load %arg7[%c0_19, %c0_20] : memref<32x1xf32, #tpu.memory_space<vmem>>, vector<32x1xf32>
    %cst_21 = arith.constant 9.99999974E-6 : f32
    %41 = vector.broadcast %cst_21 : f32 to vector<32x1xf32>
    %42 = arith.addf %39, %41 : vector<32x1xf32>
    %43 = math.rsqrt %42 : vector<32x1xf32>
    %44 = arith.mulf %40, %43 : vector<32x1xf32>
    %45 = vector.broadcast %44 : vector<32x1xf32> to vector<32x128xf32>
    %46 = arith.mulf %34, %45 : vector<32x128xf32>
    %c0_22 = arith.constant 0 : index
    %c0_23 = arith.constant 0 : index
    %47 = vector.load %arg8[%c0_22, %c0_23] : memref<32x1xf32, #tpu.memory_space<vmem>>, vector<32x1xf32>
    %48 = vector.broadcast %47 : vector<32x1xf32> to vector<32x128xf32>
    %49 = arith.addf %46, %48 : vector<32x128xf32>
    %cst_24 = arith.constant 0.000000e+00 : f32
    %50 = vector.broadcast %cst_24 : f32 to vector<32x128xf32>
    %51 = arith.maximumf %49, %50 : vector<32x128xf32>
    %c0_25 = arith.constant 0 : index
    %c0_26 = arith.constant 0 : index
    %52 = vector.load %arg9[%c0_25, %c0_26] : memref<24x32xf32, #tpu.memory_space<vmem>>, vector<24x32xf32>
    %cst_27 = arith.constant dense<0.000000e+00> : vector<24x128xf32>
    %53 = tpu.matmul %52, %51, %cst_27 {dimension_numbers = #tpu.dot_dimension_numbers<[1], [0], [0], [1], [0, 0, 1, 1], [], []>} : vector<24x32xf32>, vector<32x128xf32>, vector<24x128xf32> -> vector<24x128xf32>
    %54 = vector.extract_strided_slice %53 {offsets = [0, 0], sizes = [8, 128], strides = [1, 1]} : vector<24x128xf32> to vector<8x128xf32>
    %55 = vector.extract_strided_slice %53 {offsets = [8, 0], sizes = [8, 128], strides = [1, 1]} : vector<24x128xf32> to vector<8x128xf32>
    %56 = vector.extract_strided_slice %53 {offsets = [16, 0], sizes = [8, 128], strides = [1, 1]} : vector<24x128xf32> to vector<8x128xf32>
    %c1_i32 = arith.constant 1 : i32
    %57 = tpu.dynamic_rotate %54 by %c1_i32 dim 1 : vector<8x128xf32>, i32 -> vector<8x128xf32>
    %c0_28 = arith.constant 0 : index
    %c0_29 = arith.constant 0 : index
    %58 = vector.load %arg1[%c0_28, %c0_29] : memref<1x128xf32, #tpu.memory_space<vmem>>, vector<1x128xf32>
    %59 = vector.broadcast %58 : vector<1x128xf32> to vector<8x128xf32>
    %60 = arith.mulf %57, %59 : vector<8x128xf32>
    %c127_i32 = arith.constant 127 : i32
    %61 = tpu.dynamic_rotate %56 by %c127_i32 dim 1 : vector<8x128xf32>, i32 -> vector<8x128xf32>
    %c0_30 = arith.constant 0 : index
    %c0_31 = arith.constant 0 : index
    %62 = vector.load %arg2[%c0_30, %c0_31] : memref<1x128xf32, #tpu.memory_space<vmem>>, vector<1x128xf32>
    %63 = vector.broadcast %62 : vector<1x128xf32> to vector<8x128xf32>
    %64 = arith.mulf %61, %63 : vector<8x128xf32>
    %65 = arith.addf %55, %60 : vector<8x128xf32>
    %66 = arith.addf %65, %64 : vector<8x128xf32>
    %c0_32 = arith.constant 0 : index
    %c0_33 = arith.constant 0 : index
    %67 = vector.load %arg10[%c0_32, %c0_33] : memref<8x1xf32, #tpu.memory_space<vmem>>, vector<8x1xf32>
    %68 = vector.broadcast %67 : vector<8x1xf32> to vector<8x128xf32>
    %69 = arith.addf %66, %68 : vector<8x128xf32>
    %c0_34 = arith.constant 0 : index
    %c0_35 = arith.constant 0 : index
    %70 = vector.load %arg11[%c0_34, %c0_35] : memref<12x128xf32, #tpu.memory_space<vmem>>, vector<4x128xf32>
    tpu.vector_store %arg11[%c0_34, %c0_35], %0 {strides = array<i32>} : memref<12x128xf32, #tpu.memory_space<vmem>>, vector<4x128xf32>,
    %c4 = arith.constant 4 : index
    %c0_36 = arith.constant 0 : index
    %71 = vector.load %arg11[%c4, %c0_36] : memref<12x128xf32, #tpu.memory_space<vmem>>, vector<8x128xf32>
    tpu.vector_store %arg11[%c4, %c0_36], %69 {strides = array<i32>} : memref<12x128xf32, #tpu.memory_space<vmem>>, vector<8x128xf32>,
    return
  }
}

</mosaic_0001>

<bundles_post_ra>
// kernel: tpu_custom_call.1
= control target key start
LH: loop header
LB: loop body
LE: loop exit
PB: predicated region body
PF: predicated region fallthrough
CT: control target
= control target key end

     0   :  { %vm40_vm0 = vcmask 1043456   ;;  %s601_s0 = inlined_call_operand.vmem [shape: f32[4,128], index: 0, kind: input, shape index: {}]   ;;  %s602_s1 = inlined_call_operand.vmem [shape: f32[1,128], index: 1, kind: input, shape index: {}]   ;;  %s603_s2 = inlined_call_operand.vmem [shape: f32[1,128], index: 2, kind: input, shape index: {}]   ;;  %s604_s3 = inlined_call_operand.vmem [shape: f32[4,1], index: 3, kind: input, shape index: {}]   ;;  %s605_s4 = inlined_call_operand.vmem [shape: f32[4,1], index: 4, kind: input, shape index: {}]   ;;  %s606_s5 = inlined_call_operand.vmem [shape: f32[32,4], index: 5, kind: input, shape index: {}]   ;;  %s607_s6 = inlined_call_operand.vmem [shape: f32[32,1], index: 6, kind: input, shape index: {}]   ;;  %s608_s7 = inlined_call_operand.vmem [shape: f32[32,1], index: 7, kind: input, shape index: {}]   ;;  %s609_s8 = inlined_call_operand.vmem [shape: f32[32,1], index: 8, kind: input, shape index: {}]   ;;  %s610_s9 = inlined_call_operand.vmem [shape: f32[24,32], index: 9, kind: input, shape index: {}]   ;;  %s611_s10 = inlined_call_operand.vmem [shape: f32[8,1], index: 10, kind: input, shape index: {}]   ;;  %s612_s11 = inlined_call_operand.hbm [shape: f32[12,128], index: 11, kind: output, shape index: {}]  }
   0x1   :  { %v39_v0 = vld [vmem:[%s601_s0] sm:$0xf] }
   0x2   :  { %v41_v1 = vsel %vm40_vm0, %v39_v0, 0.0  ;;  %353 = vst [vmem:[#allocation2] sm:$0xf] %v39_v0 }
   0x3   :  { %42 = vadd.xlane.f32.xlu0 %v41_v1 }
   0x4   :  { %16 = vsyncpa [#allocation3], 0  ;;  %v433_v7 = vmov 0   ;;  %v51_v16 = vld [vmem:[%s604_s3] sm:$0xf]  ;;  %v83_v22 = vld [vmem:[%s607_s6 + $0x8] sm:$0xff] }
   0x5   :  { %392 = vset.pattern.permute.xlu1 %v433_v7  ;;  %394 = vset.pattern.permute.xlu0 %v433_v7  ;;  %v70_v20 = vld [vmem:[%s605_s4] sm:$0xf]  ;;  %v85_v23 = vld [vmem:[%s607_s6 + $0x18] sm:$0xff]  ;;  %v84_v24 = vld [vmem:[%s607_s6 + $0x10] sm:$0xff]  ;;  %vm106_vm4 = vcmask 31744   ;;  %s434_s13 = smov 1  }
   0x6   :  { %393 = vset.pattern.permute.xlu2 %v433_v7  ;;  %v82_v21 = vld [vmem:[%s607_s6] sm:$0xff]  ;;  %v80_v31 = vld [vmem:[%s606_s5 + $0x10] sm:$0xff]  ;;  %v79_v32 = vld [vmem:[%s606_s5 + $0x8] sm:$0xff]  ;;  %s435_s14 = smov 127   ;;  %s438_s20 = smov 8  }
   0x7   :  { %103 = vperm.xlu2 %393, %v85_v23   ;;  %v78_v30 = vld [vmem:[%s606_s5] sm:$0xff]  ;;  %v81_v33 = vld [vmem:[%s606_s5 + $0x18] sm:$0xff]  ;;  %v261_v1 = vld [vmem:[%s609_s8 + $0x10] sm:$0xff] }
   0x8   :  { %v262_v46 = vld [vmem:[%s609_s8 + $0x18] sm:$0xff]  ;;  %v259_v47 = vld [vmem:[%s609_s8] sm:$0xff] }
   0x9   :  { %v346_v48 = vld [vmem:[%s611_s10] sm:$0xff]  ;;  %s361_s10 = sshll.u32 %s612_s11, 4  ;;  %s362_s10 = int_to_ptr.hbm [resolvable:$true] %s361_s10 }
   0xf   :  { %98 = vperm.xlu2 %393, %v84_v24  }
  0x61   :  { %v104_v34 = vpop.permute.xlu2 %103 }
  0x69   :  { %v99_v36 = vpop.permute.xlu2 %98 }
  0x76   :  { %v43_v2 = vpop.xlane.xlu0 %42 }
  0x77   :  { %v44_v3 = vmul.f32 0.0078125, %v43_v2 }
  0x79   :  { %v45_v4 = vsub.f32 %v39_v0, %v44_v3 }
  0x7b   :  { %v46_v5 = vmul.f32 %v45_v4, %v45_v4 }
  0x7d   :  { %v47_v6 = vsel %vm40_vm0, %v46_v5, 0.0 }
  0x7e   :  { %48 = vadd.xlane.f32.xlu0 %v47_v6 }
  0x92   :  { %93 = vperm.xlu0 %394, %v83_v22  }
  0xf1   :  { %v49_v8 = vpop.xlane.xlu0 %48 }
  0xf2   :  { %v50_v9 = vmul.f32 0.0078125, %v49_v8 }
  0xf4   :  { %v52_v10 = vadd.f32 1e-05, %v50_v9 }
  0xf6   :  { %397 = vrsqrt.f32 %v52_v10  ;;  %vm59_vm2 = vweird.f32 %v52_v10 }
  0xfc   :  { %v398_v11 = vpop.eup %397 }
  0xfd   :  { %v54_v12 = vmul.f32 %v398_v11, %v52_v10  ;;  %vm60_vm1 = vweird.f32 %v398_v11 }
  0xfe   :  { %vm61_vm3 = vmor %vm59_vm2, %vm60_vm1  ;;  %vm294_vm1 = vcmask 261120  }
  0xff   :  { %v55_v13 = vmul.f32 %v398_v11, %v54_v12 }
 0x101   :  { %v56_v14 = vmul.f32 0.5, %v55_v13 }
 0x103   :  { %v57_v15 = vsub.f32 1.5, %v56_v14 }
 0x104   :  { %v94_v38 = vpop.permute.xlu0 %93 }
 0x105   :  { %v58_v17 = vmul.f32 %v398_v11, %v57_v15 }
 0x107   :  { %v62_v18 = vsel %vm61_vm3, %v398_v11, %v58_v17 }
 0x108   :  { %v63_v19 = vmul.f32 %v62_v18, %v51_v16 }
 0x10a   :  { %66 = vperm.xlu1 %392, %v63_v19   ;;  %v185_v19 = vld [vmem:[%s608_s7 + $0x10] sm:$0xff] }
 0x112   :  { %73 = vperm.xlu1 %392, %v70_v20  }
 0x11a   :  { %88 = vperm.xlu1 %392, %v82_v21  }
 0x17c   :  { %v67_v25 = vpop.permute.xlu1 %66 }
 0x17d   :  { %v69_v26 = vmul.f32 %v67_v25, %v45_v4 }
 0x184   :  { %v74_v27 = vpop.permute.xlu1 %73 }
 0x185   :  { %v76_v28 = vadd.f32 %v74_v27, %v69_v26 }
 0x187   :  { %v77_v29 = vmax.f32 %v76_v28, 0.0 }
 0x189   :  { %373 = vmatpush.msk.msra.mxu0 %vm40_vm0, %v77_v29  ;;  %381 = vmatpush.msk.msra.mxu2 %vm40_vm0, %v77_v29  ;;  %v260_v29 = vld [vmem:[%s609_s8 + $0x8] sm:$0xff] }
 0x18a   :  { %374 = vmatmul.msk.f32.vlgmr.msra.gmra.mxu0 %vm106_vm4, %v78_v30  ;;  %376 = vmatmul.msk.f32.vlgmr.msra.gmra.mxu2 %vm106_vm4, %v80_v31 }
 0x18c   :  { %v89_v44 = vpop.permute.xlu1 %88 }
 0x192   :  { %375 = vmatmul.msk.f32.gmra.mxu0 %vm106_vm4, %v79_v32  ;;  %377 = vmatmul.msk.f32.gmra.mxu2 %vm106_vm4, %v81_v33 }
 0x207   :  { %v139_v35 = vpop.f32.mrf.mxu0 }
 0x208   :  { %v140_v45 = vadd.f32 %v139_v35, %v89_v44  ;;  %v186_v44 = vld [vmem:[%s608_s7 + $0x18] sm:$0xff] }
 0x20d   :  { %v145_v37 = vpop.f32.mrf.mxu2 }
 0x20e   :  { %v146_v39 = vadd.f32 %v145_v37, %v99_v36  ;;  %v184_v37 = vld [vmem:[%s608_s7 + $0x8] sm:$0xff] }
 0x20f   :  { %v142_v40 = vpop.f32.mrf.mxu0 }
 0x210   :  { %v143_v41 = vadd.f32 %v142_v40, %v94_v38  ;;  %155 = vadd.xlane.f32.xlu1 %v146_v39 }
 0x212   :  { %153 = vadd.xlane.f32.xlu0 %v143_v41 }
 0x215   :  { %v148_v42 = vpop.f32.mrf.mxu2 }
 0x216   :  { %v149_v43 = vadd.f32 %v148_v42, %v104_v34 }
 0x218   :  { %157 = vadd.xlane.f32.xlu2 %v149_v43 }
 0x220   :  { %151 = vadd.xlane.f32.xlu2 %v140_v45 }
 0x226   :  { %280 = vperm.xlu0 %394, %v262_v46  }
 0x22e   :  { %265 = vperm.xlu0 %394, %v259_v47  }
 0x236   :  { %349 = vperm.xlu0 %394, %v346_v48   ;;  %v183_v48 = vld [vmem:[%s608_s7] sm:$0xff] }
 0x283   :  { %v156_v49 = vpop.xlane.xlu1 %155 }
 0x284   :  { %v161_v50 = vmul.f32 0.0078125, %v156_v49 }
 0x285   :  { %v154_v55 = vpop.xlane.xlu0 %153 }
 0x286   :  { %v545_v51 = vsub.f32 %v146_v39, %v161_v50  ;;  %v160_v57 = vmul.f32 0.0078125, %v154_v55 }
 0x288   :  { %v169_v52 = vmul.f32 %v545_v51, %v545_v51  ;;  %v553_v60 = vsub.f32 %v143_v41, %v160_v57 }
 0x28a   :  { %175 = vadd.xlane.f32.xlu1 %v169_v52  ;;  %v168_v0 = vmul.f32 %v553_v60, %v553_v60 }
 0x28b   :  { %v158_v53 = vpop.xlane.xlu2 %157 }
 0x28c   :  { %v162_v54 = vmul.f32 0.0078125, %v158_v53 }
 0x28e   :  { %v549_v56 = vsub.f32 %v149_v43, %v162_v54 }
 0x290   :  { %v170_v58 = vmul.f32 %v549_v56, %v549_v56 }
 0x292   :  { %177 = vadd.xlane.f32.xlu2 %v170_v58 }
 0x293   :  { %v152_v59 = vpop.xlane.xlu2 %151 }
 0x294   :  { %v159_v61 = vmul.f32 0.0078125, %v152_v59 }
 0x296   :  { %v555_v62 = vsub.f32 %v140_v45, %v159_v61 }
 0x298   :  { %v167_v63 = vmul.f32 %v555_v62, %v555_v62  ;;  %v281_v55 = vpop.permute.xlu0 %280 }
 0x29a   :  { %171 = vadd.xlane.f32.xlu1 %v167_v63  ;;  %173 = vadd.xlane.f32.xlu2 %v168_v0 }
 0x2b3   :  { %275 = vperm.xlu1 %392, %v261_v1  }
 0x2fd   :  { %v176_v2 = vpop.xlane.xlu1 %175 }
 0x2fe   :  { %v181_v3 = vmul.f32 0.0078125, %v176_v2 }
 0x300   :  { %v189_v4 = vadd.f32 1e-05, %v181_v3 }
 0x302   :  { %399 = vrsqrt.f32 %v189_v4  ;;  %vm217_vm6 = vweird.f32 %v189_v4 }
 0x305   :  { %v178_v5 = vpop.xlane.xlu2 %177 }
 0x306   :  { %v182_v6 = vmul.f32 0.0078125, %v178_v5 }
 0x308   :  { %v400_v7 = vpop.eup %399  ;;  %v190_v9 = vadd.f32 1e-05, %v182_v6 }
 0x309   :  { %v212_v8 = vmul.f32 %v400_v7, %v189_v4  ;;  %vm218_vm5 = vweird.f32 %v400_v7 }
 0x30a   :  { %401 = vrsqrt.f32 %v190_v9  ;;  %vm219_vm7 = vmor %vm217_vm6, %vm218_vm5  ;;  %vm227_vm12 = vweird.f32 %v190_v9 }
 0x30b   :  { %v213_v10 = vmul.f32 %v400_v7, %v212_v8 }
 0x30d   :  { %v214_v11 = vmul.f32 0.5, %v213_v10  ;;  %v172_v12 = vpop.xlane.xlu1 %171  ;;  %v174_v13 = vpop.xlane.xlu2 %173 }
 0x30e   :  { %v179_v14 = vmul.f32 0.0078125, %v172_v12  ;;  %v180_v15 = vmul.f32 0.0078125, %v174_v13  ;;  %v395_v13 = vld [vmem:[%s602_s1] ss:$0 sm:$0xff]  ;;  %s437_s1 = smov 128  }
 0x30f   :  { %v215_v16 = vsub.f32 1.5, %v214_v11 }
 0x310   :  { %v188_v17 = vadd.f32 1e-05, %v180_v15  ;;  %v187_v18 = vadd.f32 1e-05, %v179_v14  ;;  %v402_v21 = vpop.eup %401 }
 0x311   :  { %v216_v20 = vmul.f32 %v400_v7, %v215_v16  ;;  %v222_v24 = vmul.f32 %v402_v21, %v190_v9  ;;  %vm228_vm11 = vweird.f32 %v402_v21  ;;  %v292_v9 = vld [vmem:[%s610_s9 + $0x8] sm:$0xff]  ;;  %v396_v16 = vld [vmem:[%s603_s2] ss:$0 sm:$0xff] }
 0x312   :  { %403 = vrsqrt.f32 %v188_v17  ;;  %vm207_vm9 = vweird.f32 %v188_v17  ;;  %vm229_vm13 = vmor %vm227_vm12, %vm228_vm11  ;;  %vm197_vm15 = vweird.f32 %v187_v18 }
 0x313   :  { %v220_v22 = vsel %vm219_vm7, %v400_v7, %v216_v20  ;;  %405 = vrsqrt.f32 %v187_v18  ;;  %v223_v26 = vmul.f32 %v402_v21, %v222_v24  ;;  %v266_v7 = vpop.permute.xlu0 %265 }
 0x314   :  { %v233_v23 = vmul.f32 %v220_v22, %v185_v19 }
 0x315   :  { %v224_v31 = vmul.f32 0.5, %v223_v26 }
 0x316   :  { %247 = vperm.xlu1 %392, %v233_v23  }
 0x317   :  { %v225_v35 = vsub.f32 1.5, %v224_v31 }
 0x318   :  { %v404_v25 = vpop.eup %403 }
 0x319   :  { %v202_v27 = vmul.f32 %v404_v25, %v188_v17  ;;  %v406_v28 = vpop.eup %405  ;;  %vm208_vm8 = vweird.f32 %v404_v25  ;;  %v226_v42 = vmul.f32 %v402_v21, %v225_v35 }
 0x31a   :  { %v192_v32 = vmul.f32 %v406_v28, %v187_v18  ;;  %vm209_vm10 = vmor %vm207_vm9, %vm208_vm8  ;;  %vm198_vm14 = vweird.f32 %v406_v28 }
 0x31b   :  { %v203_v30 = vmul.f32 %v404_v25, %v202_v27  ;;  %v230_v45 = vsel %vm229_vm13, %v402_v21, %v226_v42  ;;  %vm199_vm0 = vmor %vm197_vm15, %vm198_vm14  ;;  %v350_v21 = vpop.permute.xlu0 %349 }
 0x31c   :  { %v193_v36 = vmul.f32 %v406_v28, %v192_v32  ;;  %v234_v46 = vmul.f32 %v230_v45, %v186_v44 }
 0x31d   :  { %v204_v33 = vmul.f32 0.5, %v203_v30 }
 0x31e   :  { %270 = vperm.xlu1 %392, %v260_v29   ;;  %v194_v41 = vmul.f32 0.5, %v193_v36 }
 0x31f   :  { %v205_v34 = vsub.f32 1.5, %v204_v33 }
 0x320   :  { %v195_v43 = vsub.f32 1.5, %v194_v41 }
 0x321   :  { %v206_v38 = vmul.f32 %v404_v25, %v205_v34 }
 0x322   :  { %v196_v47 = vmul.f32 %v406_v28, %v195_v43 }
 0x323   :  { %v210_v39 = vsel %vm209_vm10, %v404_v25, %v206_v38 }
 0x324   :  { %v232_v40 = vmul.f32 %v210_v39, %v184_v37  ;;  %v200_v49 = vsel %vm199_vm0, %v406_v28, %v196_v47 }
 0x325   :  { %v231_v50 = vmul.f32 %v200_v49, %v183_v48  ;;  %v276_v52 = vpop.permute.xlu1 %275 }
 0x326   :  { %242 = vperm.xlu2 %393, %v232_v40  }
 0x32e   :  { %252 = vperm.xlu2 %393, %v234_v46  }
 0x336   :  { %237 = vperm.xlu2 %393, %v231_v50  }
 0x380   :  { %v243_v53 = vpop.permute.xlu2 %242 }
 0x381   :  { %v256_v1 = vmul.f32 %v243_v53, %v553_v60  ;;  %v291_v60 = vld [vmem:[%s610_s9] sm:$0xff] }
 0x388   :  { %v248_v54 = vpop.permute.xlu1 %247  ;;  %v253_v58 = vpop.permute.xlu2 %252 }
 0x389   :  { %v257_v57 = vmul.f32 %v248_v54, %v545_v51  ;;  %v258_v59 = vmul.f32 %v253_v58, %v549_v56 }
 0x38b   :  { %v286_v61 = vadd.f32 %v281_v55, %v258_v59  ;;  %v285_v63 = vadd.f32 %v276_v52, %v257_v57 }
 0x38d   :  { %v290_v0 = vmax.f32 %v286_v61, 0.0  ;;  %v289_v3 = vmax.f32 %v285_v63, 0.0 }
 0x38f   :  { %316 = vmatpush.msra.mxu1 %v290_v0  ;;  %382 = vmatpush.msra.mxu3 %v290_v0 }
 0x390   :  { %v271_v2 = vpop.permute.xlu1 %270  ;;  %v238_v5 = vpop.permute.xlu2 %237 }
 0x391   :  { %v284_v4 = vadd.f32 %v271_v2, %v256_v1  ;;  %v255_v6 = vmul.f32 %v238_v5, %v555_v62  ;;  %317 = vmatpush.msra.mxu1 %v289_v3  ;;  %383 = vmatpush.msra.mxu3 %v289_v3  ;;  %v293_v62 = vld [vmem:[%s610_s9 + $0x10] sm:$0xff]  ;;  %s436_s9 = smov [#allocation2]  }
 0x392   :  { %s359_s18 = sshll.u32 %s436_s9, 4  ;;  %s360_s18 = int_to_ptr.vmem [resolvable:$true] %s359_s18 }
 0x393   :  { %v288_v51 = vmax.f32 %v284_v4, 0.0  ;;  %v283_v8 = vadd.f32 %v266_v7, %v255_v6 }
 0x395   :  { %318 = vmatpush.msra.mxu1 %v288_v51  ;;  %384 = vmatpush.msra.mxu3 %v288_v51  ;;  %v287_v56 = vmax.f32 %v283_v8, 0.0 }
 0x397   :  { %319 = vmatpush.msra.mxu1 %v287_v56  ;;  %385 = vmatpush.msra.mxu3 %v287_v56 }
 0x398   :  { %378 = vmatmul.msk.f32.vlgmr.msra.gmra.mxu1 %vm294_vm1, %v291_v60  ;;  %379 = vmatmul.msk.f32.vlgmr.msra.gmra.mxu3 %vm294_vm1, %v292_v9 }
 0x3a0   :  { %380 = vmatmul.msk.f32.gmra.mxu3 %vm294_vm1, %v293_v62 }
 0x415   :  { %v321_v10 = vpop.f32.mrf.mxu1 }
 0x416   :  { %330 = vrot.lane.b32.xlu2 %v321_v10, %s434_s13 }
 0x41b   :  { %v324_v11 = vpop.f32.mrf.mxu3 }
 0x423   :  { %v327_v12 = vpop.f32.mrf.mxu3 }
 0x424   :  { %337 = vrot.lane.b32.xlu1 %v327_v12, %s435_s14 }
 0x470   :  { %v331_v14 = vpop.permute.xlu2 %330 }
 0x471   :  { %v336_v15 = vmul.f32 %v395_v13, %v331_v14 }
 0x473   :  { %v344_v18 = vadd.f32 %v336_v15, %v324_v11 }
 0x496   :  { %v338_v17 = vpop.permute.xlu1 %337 }
 0x497   :  { %v343_v19 = vmul.f32 %v396_v16, %v338_v17 }
 0x499   :  { %v345_v20 = vadd.f32 %v344_v18, %v343_v19 }
 0x49b   :  { %v352_v22 = vadd.f32 %v350_v21, %v345_v20 }
 0x49d   :  { %354 = vst [vmem:[#allocation2 + $0x4] sm:$0xff] %v352_v22 }
 0x49e   :  { %367 = dma.vmem_to_hbm [thread:$0]  %s360_s18, 256, %s362_s10, [#allocation3], %s437_s1, %s437_s1, %s438_s20  }
 0x49f   :  { %431 = dma.done.wait [#allocation3], 256  }
 0x4a0   :  { %432 = vsyncadd [#allocation3], 4294967040 }
 0x4a1   :  { %372 = vsyncpa [#allocation3], 1 }

</bundles_post_ra>
